<compile_context>
chip_gen: v7x
topology: tpu7x:2x2x1
jax: 0.10.0
libtpu: 0.0.40
codegen_flags: <defaults>
</compile_context>

<pallas_src>
import functools

import numpy as np
import jax
import jax.numpy as jnp
from jax.experimental import pallas as pl
from jax.experimental.pallas import tpu as pltpu


# --------------------------------------------------------------------------- #
# Pallas kernel
# --------------------------------------------------------------------------- #
def _quantlinear_kernel(qw_ref, s_ref, z_ref, x_ref, bias_ref, o_ref,
                        w_scratch, acc_ref, *,
                        bits, maxq, pack, group_size, tk, num_k, persist_slab):
    """
    Grid = (N//tn [parallel], M//tm [arbitrary], K//tk [arbitrary]); K is innermost.

      qw_ref    : (K//pack, tn) int32     planar-repacked weights, FULL K, resident per N tile
      s_ref     : (1, gpt, tn)  wdtype    per-group scales for this (k, n) tile
      z_ref     : (1, gpt, tn)  wdtype    per-group integer zero points for this (k, n) tile
      x_ref     : (tm, tk)      x.dtype   activations
      bias_ref  : (1, tn)       f32
      o_ref     : (tm, tn)      x.dtype
      w_scratch : (slab_depth, tk, tn) wdtype  dequantized weight slab
                  slab_depth = num_k (persistent, reused across M tiles) or 1 (single M tile)
      acc_ref   : (tm, tn)      f32       matmul accumulator
    """
    m = pl.program_id(1)
    kk = pl.program_id(2)

    tkp = tk // pack
    gs = group_size
    gpt = tk // gs                       # groups per K tile (tk % gs == 0 by construction)
    tn = o_ref.shape[-1]
    slab = kk if persist_slab else 0

    # ------------------------------------------------------------------ #
    # Dequantize this (tk, tn) weight tile into the VMEM slab.
    # Only on the first M tile of each N tile; later M tiles reuse it.
    # ------------------------------------------------------------------ #
    @pl.when(m == 0)
    def _dequantize():
        if num_k == 1:
            q = qw_ref[...]                                          # (tkp, tn) int32
        else:
            k0 = pl.multiple_of(kk * tkp, tkp)                       # tkp % 8 == 0 -> aligned
            q = qw_ref[pl.ds(k0, tkp), :]                            # (tkp, tn) int32

        s_all = s_ref[0]                                             # (gpt, tn) wdtype
        z_all = z_ref[0]                                             # (gpt, tn) wdtype

        def chunk(j):
            # Planar repack: bit-field j of the packed words holds the contiguous
            # tile-local K rows [j*tkp, (j+1)*tkp) -> purely elementwise unpack.
            return ((q >> (bits * j)) & maxq).astype(w_scratch.dtype)

        if gs % tkp == 0:
            # Each shift-chunk lies entirely inside one quantization group.
            for j in range(pack):
                g = (j * tkp) // gs
                w = (chunk(j) - z_all[g:g + 1, :]) * s_all[g:g + 1, :]
                w_scratch[slab, pl.ds(j * tkp, tkp), :] = w
        elif tkp % gs == 0:
            # Each shift-chunk spans whole groups; loop groups with static slices.
            cpg = tkp // gs
            for j in range(pack):
                wj = chunk(j)
                for c in range(cpg):
                    g = j * cpg + c
                    w = (wj[c * gs:(c + 1) * gs, :] - z_all[g:g + 1, :]) * s_all[g:g + 1, :]
                    w_scratch[slab, pl.ds(j * tkp + c * gs, gs), :] = w
        else:
            # General (rare) fallback: expand per-group params to per-row once per tile.
            s_full = jnp.broadcast_to(s_all[:, None, :], (gpt, gs, tn)).reshape(tk, tn)
            z_full = jnp.broadcast_to(z_all[:, None, :], (gpt, gs, tn)).reshape(tk, tn)
            for j in range(pack):
                w = (chunk(j) - z_full[j * tkp:(j + 1) * tkp]) * s_full[j * tkp:(j + 1) * tkp]
                w_scratch[slab, pl.ds(j * tkp, tkp), :] = w

    # ------------------------------------------------------------------ #
    # MXU matmul (bf16 x bf16 by default) with f32 accumulation.
    # ------------------------------------------------------------------ #
    @pl.when(kk == 0)
    def _init_acc():
        acc_ref[...] = jnp.zeros_like(acc_ref)

    acc_ref[...] += jnp.dot(x_ref[...], w_scratch[slab],
                            preferred_element_type=jnp.float32)

    # Epilogue: bias add + downcast once per (m, n) tile, on the last K step only.
    @pl.when(kk == num_k - 1)
    def _finalize():
        o_ref[...] = (acc_ref[...] + bias_ref[...]).astype(o_ref.dtype)


# --------------------------------------------------------------------------- #
# Load-time preprocessing (offline, one-time — analogous to QuantLinear.post_init)
# --------------------------------------------------------------------------- #
def _choose_tiles(K, N, bits, group_size, tn_max, tk_max, slab_budget_bytes, w_itemsize):
    pack = 32 // bits
    # --- N tile: lane-dense, as big as the slab budget allows; prefer leaving N//tn >= 2
    # blocks so the "parallel" N axis can split across v7x's two TensorCores.
    cands = [c for c in (1024, 512, 256, 128) if c <= max(tn_max, 128)]
    tn = None
    for need_split in (True, False):
        for c in cands:
            if N % c != 0:
                continue
            if need_split and N // c < 2:
                continue
            if K * c * w_itemsize > slab_budget_bytes:   # persistent dequant slab cap
                continue
            tn = c
            break
        if tn is not None:
            break
    if tn is None:
        tn = N          # small / odd N: full row (block == full dim is always legal)

    # --- K tile: divides K; multiple of group_size (group alignment), 8*pack
    # (sublane-aligned packed rows) and 128 (lane-aligned x tile).
    unit = int(np.lcm(int(np.lcm(group_size, 8 * pack)), 128))
    tk = K
    if K > tk_max and tk_max >= unit and K % unit == 0:
        cand = (tk_max // unit) * unit
        while cand >= unit:
            if K % cand == 0:
                tk = cand
                break
            cand -= unit
    return tn, tk


def _unpack_zeros_np(qzeros, bits, maxq, G, N):
    """dequant_dim1: (G, N // pack) int32 -> (G, N) ints in [0, maxq] (numpy, tiny)."""
    pack = 32 // bits
    qz = np.ascontiguousarray(np.asarray(qzeros, dtype=np.int32)).view(np.uint32)
    z = np.empty((G, N), dtype=np.uint32)
    for j in range(pack):
        z[:, j::pack] = (qz >> (bits * j)) & maxq        # out column = c*pack + j
    return z.astype(np.int64)


def _repack_qweight_planar_np(qweight, bits, tk):
    """One-time offline repack: standard GPTQ dim0 packing (K row = word*pack + shift)
    -> planar per-K-tile layout (within tile t, shift j of word row i holds K row
    t*tk + j*(tk//pack) + i). Makes the in-kernel unpack rearrangement-free."""
    pack = 32 // bits
    maxq = (1 << bits) - 1
    qw = np.ascontiguousarray(np.asarray(qweight, dtype=np.int32)).view(np.uint32)
    Kp, N = qw.shape
    K = Kp * pack
    assert tk % pack == 0 and K % tk == 0
    tkp = tk // pack
    # Unpack to the full int table in original order: k = i*pack + j.
    w = np.empty((K, N), dtype=np.uint32)
    for j in range(pack):
        w[j::pack, :] = (qw >> (bits * j)) & maxq
    # Re-pack planar-per-tile.
    w_t = w.reshape(K // tk, pack, tkp, N)               # [t, j, i, n] = row t*tk + j*tkp + i
    out = np.zeros((K // tk, tkp, N), dtype=np.uint32)
    for j in range(pack):
        out |= w_t[:, j, :, :] << (bits * j)
    return jnp.asarray(out.reshape(Kp, N).view(np.int32))


def prepare_quantlinear_params(qweight, qzeros, scales, bias, *, bits, group_size,
                               tn_max=512, tk_max=1024, weight_dtype=jnp.bfloat16,
                               slab_budget_bytes=24 << 20):
    """Offline preprocessing: unpack qzeros, cast scales/zeros to the weight compute dtype,
    repack qweight into the planar per-K-tile layout, choose tile sizes.
    NOTE: the planar qweight is baked to the chosen tk; quantlinear_forward always uses
    the tk stored in this dict (changing tk requires re-running this function)."""
    assert bits in (2, 4, 8)
    pack = 32 // bits
    maxq = (1 << bits) - 1
    Kp, N = qweight.shape
    K = Kp * pack
    gs = K if group_size in (-1, None) else int(group_size)
    assert K % gs == 0, "infeatures must be divisible by group_size"
    G = K // gs
    assert tuple(scales.shape) == (G, N)

    w_itemsize = jnp.dtype(weight_dtype).itemsize
    tn, tk = _choose_tiles(K, N, bits, gs, tn_max, tk_max, slab_budget_bytes, w_itemsize)
    num_k = K // tk
    gpt = tk // gs

    zeros = _unpack_zeros_np(qzeros, bits, maxq, G, N)               # (G, N) small ints
    # Block scales / integer zeros per K tile: (num_k, gpt, N), in the weight compute dtype
    # (bf16 by default -> bf16-native VPU dequant on v6e/v7x; small ints are exact in bf16).
    scales_q = jnp.asarray(np.asarray(scales, np.float32).reshape(num_k, gpt, N),
                           weight_dtype)
    zeros_q = jnp.asarray(zeros.reshape(num_k, gpt, N).astype(np.float32), weight_dtype)
    if bias is None:
        bias_f32 = jnp.zeros((1, N), jnp.float32)
    else:
        bias_f32 = jnp.asarray(bias, jnp.float32).reshape(1, N)

    qweight_planar = _repack_qweight_planar_np(qweight, bits, tk)

    return dict(qweight_planar=qweight_planar, scales_q=scales_q, zeros_q=zeros_q,
                bias_f32=bias_f32, bits=bits, maxq=maxq, pack=pack, group_size=gs,
                K=K, N=N, G=G, tk=tk, tn=tn, num_k=num_k, gpt=gpt,
                weight_dtype=weight_dtype)


# --------------------------------------------------------------------------- #
# Forward wrapper
# --------------------------------------------------------------------------- #
def quantlinear_forward(x, params, *, tm_max=512):
    """out = x @ dequant(qweight).to(x.dtype) + bias, returned in x.dtype."""
    p = params
    K, N = p["K"], p["N"]
    tk, tn, pack = p["tk"], p["tn"], p["pack"]
    num_k, gpt = p["num_k"], p["gpt"]
    Kp = K // pack
    cdt = p["weight_dtype"]
    assert p["qweight_planar"].shape == (Kp, N)          # planar layout tied to params' tk

    orig_shape = x.shape
    assert orig_shape[-1] == K
    x2 = x.reshape(-1, K)
    M = x2.shape[0]
    out_dtype = x.dtype                  # torch: weight.to(x.dtype) -> out in x.dtype

    # M tile: multiple of 16 (bf16 sublane tile), as large as tm_max; pad M, don't assert.
    tm_max = max(16, (int(tm_max) // 16) * 16)
    tm = min(tm_max, max(16, ((M + 15) // 16) * 16))
    num_m = pl.cdiv(M, tm)
    M_pad = num_m * tm
    if M_pad != M:
        x2 = jnp.pad(x2, ((0, M_pad - M), (0, 0)))

    num_n = N // tn
    # Decode / single-M-tile case: no reuse across M tiles -> single (tk, tn) dequant buffer
    # instead of the K-deep persistent slab (saves VMEM, matters most on v7x's 64 MiB).
    persist_slab = num_m > 1
    slab_depth = num_k if persist_slab else 1

    # Explicit VMEM budget -> vmem_limit_bytes (raises v5e's 16 MiB default scoped limit,
    # stays well inside v7x's 64 MiB physical VMEM).
    x_bytes = jnp.dtype(x2.dtype).itemsize
    w_bytes = jnp.dtype(cdt).itemsize
    o_bytes = jnp.dtype(out_dtype).itemsize
    est_vmem = (slab_depth * tk * tn * w_bytes            # dequantized weight slab
                + tm * tn * 4                              # f32 accumulator
                + 2 * Kp * tn * 4                          # resident packed weights (dbl buf)
                + 2 * 2 * gpt * tn * w_bytes               # scales + zeros tiles
                + 2 * tm * tk * x_bytes                    # activations
                + 2 * tn * 4                               # bias
                + 2 * tm * tn * o_bytes)                   # output
    vmem_limit = int(min(56 << 20, max(32 << 20, est_vmem * 3 // 2)))

    kernel = functools.partial(
        _quantlinear_kernel,
        bits=p["bits"], maxq=p["maxq"], pack=pack, group_size=p["group_size"],
        tk=tk, num_k=num_k, persist_slab=persist_slab)

    out = pl.pallas_call(
        kernel,
        out_shape=jax.ShapeDtypeStruct((M_pad, N), out_dtype),
        grid_spec=pltpu.PrefetchScalarGridSpec(
            num_scalar_prefetch=0,
            grid=(num_n, num_m, num_k),
            in_specs=[
                # Packed weights: FULL K per N tile, block index constant over (m, k)
                # -> DMA'd once per N tile, no per-step re-fetch.
                pl.BlockSpec((Kp, tn), lambda j, m, k: (0, j)),
                pl.BlockSpec((1, gpt, tn), lambda j, m, k: (k, 0, j)),   # scales
                pl.BlockSpec((1, gpt, tn), lambda j, m, k: (k, 0, j)),   # integer zeros
                pl.BlockSpec((tm, tk), lambda j, m, k: (m, k)),          # activations
                pl.BlockSpec((1, tn), lambda j, m, k: (0, j)),           # bias
            ],
            out_specs=pl.BlockSpec((tm, tn), lambda j, m, k: (m, j)),
            scratch_shapes=[
                pltpu.VMEM((slab_depth, tk, tn), cdt),                   # dequant weight slab
                pltpu.VMEM((tm, tn), jnp.float32),                       # f32 accumulator
            ]),
        compiler_params=pltpu.CompilerParams(
            # N axis may be split across TensorCores; M and K MUST stay "arbitrary" and in
            # this order on one core (dequant-slab reuse + reduction accumulator invariant).
            dimension_semantics=("parallel", "arbitrary", "arbitrary"),
            vmem_limit_bytes=vmem_limit),
    )(p["qweight_planar"], p["scales_q"], p["zeros_q"], x2, p["bias_f32"])

    if M_pad != M:
        out = out[:M]
    return out.reshape(orig_shape[:-1] + (N,))


# --------------------------------------------------------------------------- #
# Deterministic construction of canonical QuantLinear buffers (same as .pack())
# --------------------------------------------------------------------------- #
def pack_dim0(intweight, bits):
    """Pack (K, N) ints along dim0 into (K // (32//bits), N) int32, like QuantLinear.pack."""
    pack = 32 // bits
    K, N = intweight.shape
    iw = intweight.astype(np.uint32).reshape(K // pack, pack, N)
    qw = np.zeros((K // pack, N), dtype=np.uint32)
    for j in range(pack):
        qw |= iw[:, j, :] << (bits * j)
    return qw.view(np.int32)


def pack_dim1(zeros, bits):
    """Pack (G, N) ints along dim1 into (G, N // (32//bits)) int32, like QuantLinear.pack."""
    pack = 32 // bits
    G, N = zeros.shape
    z = zeros.astype(np.uint32).reshape(G, N // pack, pack)
    qz = np.zeros((G, N // pack), dtype=np.uint32)
    for j in range(pack):
        qz |= z[:, :, j] << (bits * j)
    return qz.view(np.int32)


# --------------------------------------------------------------------------- #
# Demo / self-test
# --------------------------------------------------------------------------- #
if __name__ == "__main__":
    bits = 4
    group_size = 32
    infeatures = 256      # divisible by 32 (module requirement)
    outfeatures = 256     # divisible by 32
    maxq = 2 ** bits - 1
    G = infeatures // group_size

    key = jax.random.PRNGKey(0)
    k_w, k_z, k_s, k_x1, k_x2, k_b = jax.random.split(key, 6)

    intweight = np.asarray(
        jax.random.randint(k_w, (infeatures, outfeatures), 0, maxq + 1, dtype=jnp.int32))
    int_zeros = np.asarray(
        jax.random.randint(k_z, (G, outfeatures), 0, maxq + 1, dtype=jnp.int32))
    scales = jax.random.uniform(k_s, (G, outfeatures), jnp.float32,
                                minval=0.01, maxval=0.02)
    bias = jax.random.normal(k_b, (outfeatures,), jnp.float32) * 0.1

    # Canonical module buffers (identical packing to QuantLinear.pack()).
    qweight = jnp.asarray(pack_dim0(intweight, bits))     # (K/pack, N) int32
    qzeros = jnp.asarray(pack_dim1(int_zeros, bits))      # (G, N/pack) int32

    def reference(x):
        """Pure-JAX reference of QuantLinear.forward (use_fake=False)."""
        w = jnp.asarray(intweight, jnp.float32)
        z = jnp.asarray(int_zeros, jnp.float32)
        weight = ((w.reshape(G, group_size, outfeatures) - z.reshape(G, 1, outfeatures))
                  * scales.reshape(G, 1, outfeatures)).reshape(infeatures, outfeatures)
        weight = weight.astype(x.dtype)                   # torch: weight.to(x.dtype)
        out = jnp.dot(x.reshape(-1, infeatures), weight,
                      preferred_element_type=jnp.float32) + bias
        return out.reshape(x.shape[:-1] + (outfeatures,)).astype(x.dtype)

    # --- Test 1: performance-default tiling, bf16 activations, single M tile
    #     (exercises the decode path with the collapsed single-buffer slab).
    params = prepare_quantlinear_params(qweight, qzeros, scales, bias,
                                        bits=bits, group_size=group_size)
    x1 = jax.random.normal(k_x1, (2, 8, infeatures), jnp.bfloat16)
    out1 = jax.block_until_ready(quantlinear_forward(x1, params))
    ref1 = reference(x1)
    assert out1.shape == (2, 8, outfeatures) and out1.dtype == x1.dtype
    np.testing.assert_allclose(np.asarray(out1, np.float32), np.asarray(ref1, np.float32),
                               rtol=2e-2, atol=4e-2)

    # --- Test 2: small tiles to exercise the multi-tile grid paths
    #     (persistent dequant-slab reuse across M tiles, K accumulation, N tiling, M padding).
    params_small = prepare_quantlinear_params(qweight, qzeros, scales, bias,
                                              bits=bits, group_size=group_size,
                                              tn_max=128, tk_max=128)
    x2 = jax.random.normal(k_x2, (2, 9, infeatures), jnp.bfloat16)   # M=18 -> padded to 32
    out2 = jax.block_until_ready(quantlinear_forward(x2, params_small, tm_max=16))
    ref2 = reference(x2)
    assert out2.shape == (2, 9, outfeatures) and out2.dtype == x2.dtype
    np.testing.assert_allclose(np.asarray(out2, np.float32), np.asarray(ref2, np.float32),
                               rtol=2e-2, atol=4e-2)

    print("KERNEL_OK")
</pallas_src>

<mosaic_0001>
module attributes {stable_mosaic.version = 11 : i64} {
  func.func @_quantlinear_kernel(%arg0: i32, %arg1: i32, %arg2: i32, %arg3: memref<32x128xi32, #tpu.memory_space<vmem>>, %arg4: memref<1x8x128xbf16, #tpu.memory_space<vmem>>, %arg5: memref<1x8x128xbf16, #tpu.memory_space<vmem>>, %arg6: memref<16x256xbf16, #tpu.memory_space<vmem>>, %arg7: memref<1x128xf32, #tpu.memory_space<vmem>>, %arg8: memref<16x128xbf16, #tpu.memory_space<vmem>>, %arg9: memref<1x256x128xbf16, #tpu.memory_space<vmem>>, %arg10: memref<16x128xf32, #tpu.memory_space<vmem>>) attributes {dimension_semantics = [#tpu.dimension_semantics<parallel>, #tpu.dimension_semantics<arbitrary>, #tpu.dimension_semantics<arbitrary>], iteration_bounds = array<i64: 2, 1, 1>, scalar_prefetch = 0 : i64, scratch_operands = 2 : i64, tpu.core_type = #tpu.core_type<tc>, window_params = [{transform_indices = @transform_0, window_bounds = array<i64: 32, 128>}, {transform_indices = @transform_1, window_bounds = array<i64: 1, 8, 128>}, {transform_indices = @transform_2, window_bounds = array<i64: 1, 8, 128>}, {transform_indices = @transform_3, window_bounds = array<i64: 16, 256>}, {transform_indices = @transform_4, window_bounds = array<i64: 1, 128>}, {transform_indices = @transform_5, window_bounds = array<i64: 16, 128>}]} {
    %c0_i32 = arith.constant 0 : i32
    %0 = arith.cmpi eq, %arg1, %c0_i32 : i32
    %1 = arith.extui %0 : i1 to i32
    %c0_i32_0 = arith.constant 0 : i32
    %2 = arith.cmpi ne, %1, %c0_i32_0 : i32
    scf.if %2 {
      %c0_13 = arith.constant 0 : index
      %c0_14 = arith.constant 0 : index
      %16 = vector.load %arg3[%c0_13, %c0_14] : memref<32x128xi32, #tpu.memory_space<vmem>>, vector<32x128xi32>
      %c0_15 = arith.constant 0 : index
      %c0_16 = arith.constant 0 : index
      %c0_17 = arith.constant 0 : index
      %17 = vector.load %arg4[%c0_15, %c0_16, %c0_17] : memref<1x8x128xbf16, #tpu.memory_space<vmem>>, vector<1x8x128xbf16>
      %18 = vector.shape_cast %17 : vector<1x8x128xbf16> to vector<8x128xbf16>
      %c0_18 = arith.constant 0 : index
      %c0_19 = arith.constant 0 : index
      %c0_20 = arith.constant 0 : index
      %19 = vector.load %arg5[%c0_18, %c0_19, %c0_20] : memref<1x8x128xbf16, #tpu.memory_space<vmem>>, vector<1x8x128xbf16>
      %20 = vector.shape_cast %19 : vector<1x8x128xbf16> to vector<8x128xbf16>
      %c0_i32_21 = arith.constant 0 : i32
      %21 = vector.broadcast %c0_i32_21 : i32 to vector<32x128xi32>
      %22 = arith.shrsi %16, %21 : vector<32x128xi32>
      %c15_i32 = arith.constant 15 : i32
      %23 = vector.broadcast %c15_i32 : i32 to vector<32x128xi32>
      %24 = arith.andi %22, %23 : vector<32x128xi32>
      %25 = arith.sitofp %24 : vector<32x128xi32> to vector<32x128xbf16>
      %26 = vector.extract_strided_slice %20 {offsets = [0, 0], sizes = [1, 128], strides = [1, 1]} : vector<8x128xbf16> to vector<1x128xbf16>
      %27 = vector.broadcast %26 : vector<1x128xbf16> to vector<32x128xbf16>
      %28 = arith.subf %25, %27 : vector<32x128xbf16>
      %29 = vector.extract_strided_slice %18 {offsets = [0, 0], sizes = [1, 128], strides = [1, 1]} : vector<8x128xbf16> to vector<1x128xbf16>
      %30 = vector.broadcast %29 : vector<1x128xbf16> to vector<32x128xbf16>
      %31 = arith.mulf %28, %30 : vector<32x128xbf16>
      %c0_22 = arith.constant 0 : index
      %c0_23 = arith.constant 0 : index
      %c0_24 = arith.constant 0 : index
      %32 = vector.load %arg9[%c0_22, %c0_23, %c0_24] : memref<1x256x128xbf16, #tpu.memory_space<vmem>>, vector<1x32x128xbf16>
      %33 = vector.shape_cast %32 : vector<1x32x128xbf16> to vector<32x128xbf16>
      %34 = vector.shape_cast %31 : vector<32x128xbf16> to vector<1x32x128xbf16>
      tpu.vector_store %arg9[%c0_22, %c0_23, %c0_24], %34 {strides = array<i32>} : memref<1x256x128xbf16, #tpu.memory_space<vmem>>, vector<1x32x128xbf16>,
      %c4_i32 = arith.constant 4 : i32
      %35 = vector.broadcast %c4_i32 : i32 to vector<32x128xi32>
      %36 = arith.shrsi %16, %35 : vector<32x128xi32>
      %c15_i32_25 = arith.constant 15 : i32
      %37 = vector.broadcast %c15_i32_25 : i32 to vector<32x128xi32>
      %38 = arith.andi %36, %37 : vector<32x128xi32>
      %39 = arith.sitofp %38 : vector<32x128xi32> to vector<32x128xbf16>
      %40 = vector.extract_strided_slice %20 {offsets = [1, 0], sizes = [1, 128], strides = [1, 1]} : vector<8x128xbf16> to vector<1x128xbf16>
      %41 = vector.broadcast %40 : vector<1x128xbf16> to vector<32x128xbf16>
      %42 = arith.subf %39, %41 : vector<32x128xbf16>
      %43 = vector.extract_strided_slice %18 {offsets = [1, 0], sizes = [1, 128], strides = [1, 1]} : vector<8x128xbf16> to vector<1x128xbf16>
      %44 = vector.broadcast %43 : vector<1x128xbf16> to vector<32x128xbf16>
      %45 = arith.mulf %42, %44 : vector<32x128xbf16>
      %c0_26 = arith.constant 0 : index
      %c32 = arith.constant 32 : index
      %c0_27 = arith.constant 0 : index
      %46 = vector.load %arg9[%c0_26, %c32, %c0_27] : memref<1x256x128xbf16, #tpu.memory_space<vmem>>, vector<1x32x128xbf16>
      %47 = vector.shape_cast %46 : vector<1x32x128xbf16> to vector<32x128xbf16>
      %48 = vector.shape_cast %45 : vector<32x128xbf16> to vector<1x32x128xbf16>
      tpu.vector_store %arg9[%c0_26, %c32, %c0_27], %48 {strides = array<i32>} : memref<1x256x128xbf16, #tpu.memory_space<vmem>>, vector<1x32x128xbf16>,
      %c8_i32 = arith.constant 8 : i32
      %49 = vector.broadcast %c8_i32 : i32 to vector<32x128xi32>
      %50 = arith.shrsi %16, %49 : vector<32x128xi32>
      %c15_i32_28 = arith.constant 15 : i32
      %51 = vector.broadcast %c15_i32_28 : i32 to vector<32x128xi32>
      %52 = arith.andi %50, %51 : vector<32x128xi32>
      %53 = arith.sitofp %52 : vector<32x128xi32> to vector<32x128xbf16>
      %54 = vector.extract_strided_slice %20 {offsets = [2, 0], sizes = [1, 128], strides = [1, 1]} : vector<8x128xbf16> to vector<1x128xbf16>
      %55 = vector.broadcast %54 : vector<1x128xbf16> to vector<32x128xbf16>
      %56 = arith.subf %53, %55 : vector<32x128xbf16>
      %57 = vector.extract_strided_slice %18 {offsets = [2, 0], sizes = [1, 128], strides = [1, 1]} : vector<8x128xbf16> to vector<1x128xbf16>
      %58 = vector.broadcast %57 : vector<1x128xbf16> to vector<32x128xbf16>
      %59 = arith.mulf %56, %58 : vector<32x128xbf16>
      %c0_29 = arith.constant 0 : index
      %c64 = arith.constant 64 : index
      %c0_30 = arith.constant 0 : index
      %60 = vector.load %arg9[%c0_29, %c64, %c0_30] : memref<1x256x128xbf16, #tpu.memory_space<vmem>>, vector<1x32x128xbf16>
      %61 = vector.shape_cast %60 : vector<1x32x128xbf16> to vector<32x128xbf16>
      %62 = vector.shape_cast %59 : vector<32x128xbf16> to vector<1x32x128xbf16>
      tpu.vector_store %arg9[%c0_29, %c64, %c0_30], %62 {strides = array<i32>} : memref<1x256x128xbf16, #tpu.memory_space<vmem>>, vector<1x32x128xbf16>,
      %c12_i32 = arith.constant 12 : i32
      %63 = vector.broadcast %c12_i32 : i32 to vector<32x128xi32>
      %64 = arith.shrsi %16, %63 : vector<32x128xi32>
      %c15_i32_31 = arith.constant 15 : i32
      %65 = vector.broadcast %c15_i32_31 : i32 to vector<32x128xi32>
      %66 = arith.andi %64, %65 : vector<32x128xi32>
      %67 = arith.sitofp %66 : vector<32x128xi32> to vector<32x128xbf16>
      %68 = vector.extract_strided_slice %20 {offsets = [3, 0], sizes = [1, 128], strides = [1, 1]} : vector<8x128xbf16> to vector<1x128xbf16>
      %69 = vector.broadcast %68 : vector<1x128xbf16> to vector<32x128xbf16>
      %70 = arith.subf %67, %69 : vector<32x128xbf16>
      %71 = vector.extract_strided_slice %18 {offsets = [3, 0], sizes = [1, 128], strides = [1, 1]} : vector<8x128xbf16> to vector<1x128xbf16>
      %72 = vector.broadcast %71 : vector<1x128xbf16> to vector<32x128xbf16>
      %73 = arith.mulf %70, %72 : vector<32x128xbf16>
      %c0_32 = arith.constant 0 : index
      %c96 = arith.constant 96 : index
      %c0_33 = arith.constant 0 : index
      %74 = vector.load %arg9[%c0_32, %c96, %c0_33] : memref<1x256x128xbf16, #tpu.memory_space<vmem>>, vector<1x32x128xbf16>
      %75 = vector.shape_cast %74 : vector<1x32x128xbf16> to vector<32x128xbf16>
      %76 = vector.shape_cast %73 : vector<32x128xbf16> to vector<1x32x128xbf16>
      tpu.vector_store %arg9[%c0_32, %c96, %c0_33], %76 {strides = array<i32>} : memref<1x256x128xbf16, #tpu.memory_space<vmem>>, vector<1x32x128xbf16>,
      %c16_i32 = arith.constant 16 : i32
      %77 = vector.broadcast %c16_i32 : i32 to vector<32x128xi32>
      %78 = arith.shrsi %16, %77 : vector<32x128xi32>
      %c15_i32_34 = arith.constant 15 : i32
      %79 = vector.broadcast %c15_i32_34 : i32 to vector<32x128xi32>
      %80 = arith.andi %78, %79 : vector<32x128xi32>
      %81 = arith.sitofp %80 : vector<32x128xi32> to vector<32x128xbf16>
      %82 = vector.extract_strided_slice %20 {offsets = [4, 0], sizes = [1, 128], strides = [1, 1]} : vector<8x128xbf16> to vector<1x128xbf16>
      %83 = vector.broadcast %82 : vector<1x128xbf16> to vector<32x128xbf16>
      %84 = arith.subf %81, %83 : vector<32x128xbf16>
      %85 = vector.extract_strided_slice %18 {offsets = [4, 0], sizes = [1, 128], strides = [1, 1]} : vector<8x128xbf16> to vector<1x128xbf16>
      %86 = vector.broadcast %85 : vector<1x128xbf16> to vector<32x128xbf16>
      %87 = arith.mulf %84, %86 : vector<32x128xbf16>
      %c0_35 = arith.constant 0 : index
      %c128 = arith.constant 128 : index
      %c0_36 = arith.constant 0 : index
      %88 = vector.load %arg9[%c0_35, %c128, %c0_36] : memref<1x256x128xbf16, #tpu.memory_space<vmem>>, vector<1x32x128xbf16>
      %89 = vector.shape_cast %88 : vector<1x32x128xbf16> to vector<32x128xbf16>
      %90 = vector.shape_cast %87 : vector<32x128xbf16> to vector<1x32x128xbf16>
      tpu.vector_store %arg9[%c0_35, %c128, %c0_36], %90 {strides = array<i32>} : memref<1x256x128xbf16, #tpu.memory_space<vmem>>, vector<1x32x128xbf16>,
      %c20_i32 = arith.constant 20 : i32
      %91 = vector.broadcast %c20_i32 : i32 to vector<32x128xi32>
      %92 = arith.shrsi %16, %91 : vector<32x128xi32>
      %c15_i32_37 = arith.constant 15 : i32
      %93 = vector.broadcast %c15_i32_37 : i32 to vector<32x128xi32>
      %94 = arith.andi %92, %93 : vector<32x128xi32>
      %95 = arith.sitofp %94 : vector<32x128xi32> to vector<32x128xbf16>
      %96 = vector.extract_strided_slice %20 {offsets = [5, 0], sizes = [1, 128], strides = [1, 1]} : vector<8x128xbf16> to vector<1x128xbf16>
      %97 = vector.broadcast %96 : vector<1x128xbf16> to vector<32x128xbf16>
      %98 = arith.subf %95, %97 : vector<32x128xbf16>
      %99 = vector.extract_strided_slice %18 {offsets = [5, 0], sizes = [1, 128], strides = [1, 1]} : vector<8x128xbf16> to vector<1x128xbf16>
      %100 = vector.broadcast %99 : vector<1x128xbf16> to vector<32x128xbf16>
      %101 = arith.mulf %98, %100 : vector<32x128xbf16>
      %c0_38 = arith.constant 0 : index
      %c160 = arith.constant 160 : index
      %c0_39 = arith.constant 0 : index
      %102 = vector.load %arg9[%c0_38, %c160, %c0_39] : memref<1x256x128xbf16, #tpu.memory_space<vmem>>, vector<1x32x128xbf16>
      %103 = vector.shape_cast %102 : vector<1x32x128xbf16> to vector<32x128xbf16>
      %104 = vector.shape_cast %101 : vector<32x128xbf16> to vector<1x32x128xbf16>
      tpu.vector_store %arg9[%c0_38, %c160, %c0_39], %104 {strides = array<i32>} : memref<1x256x128xbf16, #tpu.memory_space<vmem>>, vector<1x32x128xbf16>,
      %c24_i32 = arith.constant 24 : i32
      %105 = vector.broadcast %c24_i32 : i32 to vector<32x128xi32>
      %106 = arith.shrsi %16, %105 : vector<32x128xi32>
      %c15_i32_40 = arith.constant 15 : i32
      %107 = vector.broadcast %c15_i32_40 : i32 to vector<32x128xi32>
      %108 = arith.andi %106, %107 : vector<32x128xi32>
      %109 = arith.sitofp %108 : vector<32x128xi32> to vector<32x128xbf16>
      %110 = vector.extract_strided_slice %20 {offsets = [6, 0], sizes = [1, 128], strides = [1, 1]} : vector<8x128xbf16> to vector<1x128xbf16>
      %111 = vector.broadcast %110 : vector<1x128xbf16> to vector<32x128xbf16>
      %112 = arith.subf %109, %111 : vector<32x128xbf16>
      %113 = vector.extract_strided_slice %18 {offsets = [6, 0], sizes = [1, 128], strides = [1, 1]} : vector<8x128xbf16> to vector<1x128xbf16>
      %114 = vector.broadcast %113 : vector<1x128xbf16> to vector<32x128xbf16>
      %115 = arith.mulf %112, %114 : vector<32x128xbf16>
      %c0_41 = arith.constant 0 : index
      %c192 = arith.constant 192 : index
      %c0_42 = arith.constant 0 : index
      %116 = vector.load %arg9[%c0_41, %c192, %c0_42] : memref<1x256x128xbf16, #tpu.memory_space<vmem>>, vector<1x32x128xbf16>
      %117 = vector.shape_cast %116 : vector<1x32x128xbf16> to vector<32x128xbf16>
      %118 = vector.shape_cast %115 : vector<32x128xbf16> to vector<1x32x128xbf16>
      tpu.vector_store %arg9[%c0_41, %c192, %c0_42], %118 {strides = array<i32>} : memref<1x256x128xbf16, #tpu.memory_space<vmem>>, vector<1x32x128xbf16>,
      %c28_i32 = arith.constant 28 : i32
      %119 = vector.broadcast %c28_i32 : i32 to vector<32x128xi32>
      %120 = arith.shrsi %16, %119 : vector<32x128xi32>
      %c15_i32_43 = arith.constant 15 : i32
      %121 = vector.broadcast %c15_i32_43 : i32 to vector<32x128xi32>
      %122 = arith.andi %120, %121 : vector<32x128xi32>
      %123 = arith.sitofp %122 : vector<32x128xi32> to vector<32x128xbf16>
      %124 = vector.extract_strided_slice %20 {offsets = [7, 0], sizes = [1, 128], strides = [1, 1]} : vector<8x128xbf16> to vector<1x128xbf16>
      %125 = vector.broadcast %124 : vector<1x128xbf16> to vector<32x128xbf16>
      %126 = arith.subf %123, %125 : vector<32x128xbf16>
      %127 = vector.extract_strided_slice %18 {offsets = [7, 0], sizes = [1, 128], strides = [1, 1]} : vector<8x128xbf16> to vector<1x128xbf16>
      %128 = vector.broadcast %127 : vector<1x128xbf16> to vector<32x128xbf16>
      %129 = arith.mulf %126, %128 : vector<32x128xbf16>
      %c0_44 = arith.constant 0 : index
      %c224 = arith.constant 224 : index
      %c0_45 = arith.constant 0 : index
      %130 = vector.load %arg9[%c0_44, %c224, %c0_45] : memref<1x256x128xbf16, #tpu.memory_space<vmem>>, vector<1x32x128xbf16>
      %131 = vector.shape_cast %130 : vector<1x32x128xbf16> to vector<32x128xbf16>
      %132 = vector.shape_cast %129 : vector<32x128xbf16> to vector<1x32x128xbf16>
      tpu.vector_store %arg9[%c0_44, %c224, %c0_45], %132 {strides = array<i32>} : memref<1x256x128xbf16, #tpu.memory_space<vmem>>, vector<1x32x128xbf16>,
    } else {
    }
    %c0_i32_1 = arith.constant 0 : i32
    %3 = arith.cmpi eq, %arg2, %c0_i32_1 : i32
    %4 = arith.extui %3 : i1 to i32
    %c0_i32_2 = arith.constant 0 : i32
    %5 = arith.cmpi ne, %4, %c0_i32_2 : i32
    scf.if %5 {
      %cst_13 = arith.constant 0.000000e+00 : f32
      %16 = vector.broadcast %cst_13 : f32 to vector<16x128xf32>
      %c0_14 = arith.constant 0 : index
      %c0_15 = arith.constant 0 : index
      %17 = vector.load %arg10[%c0_14, %c0_15] : memref<16x128xf32, #tpu.memory_space<vmem>>, vector<16x128xf32>
      tpu.vector_store %arg10[%c0_14, %c0_15], %16 {strides = array<i32>} : memref<16x128xf32, #tpu.memory_space<vmem>>, vector<16x128xf32>,
    } else {
    }
    %c0 = arith.constant 0 : index
    %c0_3 = arith.constant 0 : index
    %6 = vector.load %arg10[%c0, %c0_3] : memref<16x128xf32, #tpu.memory_space<vmem>>, vector<16x128xf32>
    %c0_4 = arith.constant 0 : index
    %c0_5 = arith.constant 0 : index
    %7 = vector.load %arg6[%c0_4, %c0_5] : memref<16x256xbf16, #tpu.memory_space<vmem>>, vector<16x256xbf16>
    %c0_6 = arith.constant 0 : index
    %c0_7 = arith.constant 0 : index
    %c0_8 = arith.constant 0 : index
    %8 = vector.load %arg9[%c0_6, %c0_7, %c0_8] : memref<1x256x128xbf16, #tpu.memory_space<vmem>>, vector<1x256x128xbf16>
    %9 = vector.shape_cast %8 : vector<1x256x128xbf16> to vector<256x128xbf16>
    %cst = arith.constant dense<0.000000e+00> : vector<16x128xf32>
    %10 = tpu.matmul %7, %9, %cst {dimension_numbers = #tpu.dot_dimension_numbers<[1], [0], [0], [1], [0, 0, 1, 1], [], []>} : vector<16x256xbf16>, vector<256x128xbf16>, vector<16x128xf32> -> vector<16x128xf32>
    %11 = arith.addf %6, %10 : vector<16x128xf32>
    %c0_9 = arith.constant 0 : index
    %c0_10 = arith.constant 0 : index
    %12 = vector.load %arg10[%c0_9, %c0_10] : memref<16x128xf32, #tpu.memory_space<vmem>>, vector<16x128xf32>
    tpu.vector_store %arg10[%c0_9, %c0_10], %11 {strides = array<i32>} : memref<16x128xf32, #tpu.memory_space<vmem>>, vector<16x128xf32>,
    %c0_i32_11 = arith.constant 0 : i32
    %13 = arith.cmpi eq, %arg2, %c0_i32_11 : i32
    %14 = arith.extui %13 : i1 to i32
    %c0_i32_12 = arith.constant 0 : i32
    %15 = arith.cmpi ne, %14, %c0_i32_12 : i32
    scf.if %15 {
      %c0_13 = arith.constant 0 : index
      %c0_14 = arith.constant 0 : index
      %16 = vector.load %arg10[%c0_13, %c0_14] : memref<16x128xf32, #tpu.memory_space<vmem>>, vector<16x128xf32>
      %c0_15 = arith.constant 0 : index
      %c0_16 = arith.constant 0 : index
      %17 = vector.load %arg7[%c0_15, %c0_16] : memref<1x128xf32, #tpu.memory_space<vmem>>, vector<1x128xf32>
      %18 = vector.broadcast %17 : vector<1x128xf32> to vector<16x128xf32>
      %19 = arith.addf %16, %18 : vector<16x128xf32>
      %20 = arith.truncf %19 : vector<16x128xf32> to vector<16x128xbf16>
      %c0_17 = arith.constant 0 : index
      %c0_18 = arith.constant 0 : index
      %21 = vector.load %arg8[%c0_17, %c0_18] : memref<16x128xbf16, #tpu.memory_space<vmem>>, vector<16x128xbf16>
      tpu.vector_store %arg8[%c0_17, %c0_18], %20 {strides = array<i32>} : memref<16x128xbf16, #tpu.memory_space<vmem>>, vector<16x128xbf16>,
    } else {
    }
    return
  }
  func.func @transform_0(%arg0: i32, %arg1: i32, %arg2: i32) -> (i32, i32) {
    %c0_i32 = arith.constant 0 : i32
    %c0_i32_0 = arith.constant 0 : i32
    return %c0_i32, %arg0 : i32, i32
  }
  func.func @transform_1(%arg0: i32, %arg1: i32, %arg2: i32) -> (i32, i32, i32) {
    %c0_i32 = arith.constant 0 : i32
    %c0_i32_0 = arith.constant 0 : i32
    return %arg2, %c0_i32, %arg0 : i32, i32, i32
  }
  func.func @transform_2(%arg0: i32, %arg1: i32, %arg2: i32) -> (i32, i32, i32) {
    %c0_i32 = arith.constant 0 : i32
    %c0_i32_0 = arith.constant 0 : i32
    return %arg2, %c0_i32, %arg0 : i32, i32, i32
  }
  func.func @transform_3(%arg0: i32, %arg1: i32, %arg2: i32) -> (i32, i32) {
    %c0_i32 = arith.constant 0 : i32
    return %arg1, %arg2 : i32, i32
  }
  func.func @transform_4(%arg0: i32, %arg1: i32, %arg2: i32) -> (i32, i32) {
    %c0_i32 = arith.constant 0 : i32
    %c0_i32_0 = arith.constant 0 : i32
    return %c0_i32, %arg0 : i32, i32
  }
  func.func @transform_5(%arg0: i32, %arg1: i32, %arg2: i32) -> (i32, i32) {
    %c0_i32 = arith.constant 0 : i32
    return %arg1, %arg0 : i32, i32
  }
}

</mosaic_0001>

<bundles_post_ra>
// kernel: tpu_custom_call.1
= control target key start
LH: loop header
LB: loop body
LE: loop exit
PB: predicated region body
PF: predicated region fallthrough
CT: control target
= control target key end

     0   :  { %s1719_s0 = inlined_call_operand.hbm [shape: s32[32,256], index: 0, kind: input, shape index: {}]   ;;  %s1720_s1 = inlined_call_operand.hbm [shape: bf16[1,8,256], index: 1, kind: input, shape index: {}]   ;;  %s1721_s2 = inlined_call_operand.hbm [shape: bf16[1,8,256], index: 2, kind: input, shape index: {}]   ;;  %s1722_s3 = inlined_call_operand.hbm [shape: bf16[16,256], index: 3, kind: input, shape index: {}]   ;;  %s1723_s4 = inlined_call_operand.vmem [shape: f32[1,256], index: 4, kind: input, shape index: {}]   ;;  %s1724_s5 = inlined_call_operand.hbm [shape: bf16[16,256], index: 5, kind: output, shape index: {}]  }
   0x1   :  { %1743 = sst [smem:[#allocation24_spill]] %s1719_s0 }
   0x2   :  { %1744 = sst [smem:[#allocation25_spill]] %s1720_s1 }
   0x3   :  { %1745 = sst [smem:[#allocation26_spill]] %s1724_s5 }
   0x4   :  { %10 = vsyncpa [#allocation5], 0 }
   0x5   :  { %12 = vsyncpa [#allocation5 + $0x1], 0 }
   0x6   :  { %13 = vsyncpa [#allocation8], 0 }
   0x7   :  { %15 = vsyncpa [#allocation8 + $0x1], 0 }
   0x8   :  { %16 = vsyncpa [#allocation11], 0 }
   0x9   :  { %17 = vsyncpa [#allocation6], 0 }
   0xa   :  { %19 = vsyncpa [#allocation6 + $0x1], 0  ;;  %s1310_s18 = smov 0   ;;  %s1312_s19 = smov 0  }
   0xb   :  { %s1314_s20 = smov 0   ;;  %s1316_s21 = smov 0  }
   0xc   :  { %s1318_s22 = smov 0   ;;  %s1320_s23 = smov 0  }
   0xd LB: > { %1746 = sst [smem:[#allocation17_spill]] %s1247_s18  ;;  %s44_s24 = sadd.s32 1, %s1263_s22  ;;  %s1267_s23 = sphi %s1320_s23, %s25_s23   ;;  %s1263_s22 = sphi %s1318_s22, %s1781_s22   ;;  %s1259_s21 = sphi %s1316_s21, %s1780_s21   ;;  %s1255_s20 = sphi %s1314_s20, %s1779_s20   ;;  %s1251_s19 = sphi %s1312_s19, %s1783_s19   ;;  %s1247_s18 = sphi %s1310_s18, %s1782_s18  }
   0xe   : > { %1747 = sst [smem:[#allocation18_spill]] %s1255_s20  ;;  %s51_s25 = sadd.s32 1, %s1255_s20 }
   0xf   : > { %1748 = sst [smem:[#allocation19_spill]] %s1263_s22  ;;  %p46_p0 = scmp.ge.s32.totalorder %s44_s24, 2 }
  0x10   : > { %1749 = sst [smem:[#allocation20_spill]] %s1267_s23  ;;  %p1725_p1 = scmp.ne.s32.totalorder %s1255_s20, %s1251_s19 }
  0x11   : > { %p59_p2 = scmp.eq.s32.totalorder %s1267_s23, 0  ;;  %s1785_s24 = smov (%p46_p0, %s44_s24), 0 }
  0x12   : > { %1750 = sst [smem:[#allocation21_spill]] %s1785_s24  ;;  %p998_p5 = scmp.lt.s32.totalorder %s1267_s23, 2 }
  0x13   : > { %p60_p4 = por %p59_p2, %p1725_p1  ;;  %s48_s26 = ssub.s32 %s1263_s22, %s1785_s24 }
  0x14   : > { %s1355_s27 = sand.u32 1, %s1255_s20   ;;  %p49_p6 = scmp.eq.s32.totalorder %s48_s26, 0 }
  0x15   : > { %s913_s28 = sshll.u32 %s1355_s27, 5  ;;  %p1358_p7 = pnand %p998_p5, %p60_p4 }
  0x16   : > { %s1363_s30 = scalar_select %p49_p6, %s1255_s20, %s51_s25  }
  0x17   : > { %s1751_s29 = scalar_select %p1358_p7, 1, 0 }
  0x18   : > { %1752 = sst [smem:[#allocation22_spill]] %s1363_s30  ;;  %s249_s6 = scalar_lea.vmem [#allocation4], %s913_s28 }
  0x19   : > { %s255_s7 = sshll.u32 %s249_s6, 4  ;;  %s265_s8 = sand.u32 1, %s1267_s23   ;;  %s1366_s7 = int_to_ptr.vmem [resolvable:$true] %s255_s7 }
  0x1a   : > { %s1726_s9 = sshll.u32 %s1355_s27, 2  ;;  %s916_s10 = sshll.u32 %s1263_s22, 6 }
  0x1b   : > { %s1753_s1 = sld [smem:[#allocation25_spill]]  ;;  %s269_s14 = scalar_lea.vmem [#allocation7], %s1726_s9 }
  0x1c   : > { %s278_s15 = sshll.u32 %s269_s14, 4  ;;  %s1382_s25 = scalar_lea.hbm %s1721_s2, %s916_s10  ;;  %s1377_s15 = int_to_ptr.vmem [resolvable:$true] %s278_s15 }
  0x1d   : > { %s1384_s26 = scalar_lea.sflag [#allocation8], %s265_s8  ;;  %p1390_p9 = pneg %p1358_p7 }
  0x1f   : > { %s1754_s6 = scalar_select %p1390_p9, 1, 0 }
  0x21   : > { %s1373_s13 = scalar_lea.hbm %s1753_s1, %s916_s10  ;;  %s1064_s14 = scalar_lea.hbm %s1753_s1, 128 }
  0x22   : > { %s1059_s28 = scalar_lea.hbm %s1373_s13, 64  ;;  %p1065_p12 = scmp.lt.u32.totalorder %s1373_s13, %s1753_s1 }
  0x23   : > { %p1060_p8 = scmp.ne.s32.totalorder %s1373_s13, %s1059_s28  ;;  %p1066_p13 = scmp.lt.u32.totalorder %s1064_s14, %s1059_s28 }
  0x24   : > { %p1068_p2 = scmp.lt.u32.totalorder %s1059_s28, %s1373_s13 }
  0x25   : > { %p1062_p10 = pnand %p1390_p9, %p1060_p8  ;;  %p1067_p0 = por %p1066_p13, %p1065_p12 }
  0x27   : > { %p1063_p11 = pneg %p1062_p10  ;;  %p1069_p4 = por %p1068_p2, %p1067_p0 }
  0x29   : > { %p1070_p5 = pnand %p1069_p4, %p1063_p11 }
  0x2b   : > { %1073 = shalt.err (!%p1070_p5)
}
  0x2c   : > { %s1074_s8 = scalar_lea.vmem %s1377_s15, 64  ;;  %s1269_s17 = smov [#allocation7]  }
  0x2d   : > { %p1075_p6 = scmp.ne.s32.totalorder %s1377_s15, %s1074_s8  ;;  %s1079_s11 = sshll.u32 %s1269_s17, 4  ;;  %s1080_s11 = int_to_ptr.vmem [resolvable:$false] %s1079_s11 }
  0x2e   : > { %s1081_s12 = scalar_lea.vmem %s1080_s11, 128  ;;  %p1082_p3 = scmp.lt.s32.totalorder %s1377_s15, %s1080_s11 }
  0x2f   : > { %p1077_p8 = pnand %p1075_p6, %p1390_p9  ;;  %p1083_p1 = scmp.lt.s32.totalorder %s1081_s12, %s1074_s8 }
  0x31   : > { %p1078_p10 = pneg %p1077_p8  ;;  %p1084_p12 = por %p1083_p1, %p1082_p3 }
  0x33   : > { %p1085_p13 = pnand %p1084_p12, %p1078_p10 }
  0x35   : > { %1088 = shalt.err (!%p1085_p13)
}
  0x36   : > { %989 = dma.hbm_to_vmem [thread:$0]  (!%p1358_p7), %s1373_s13, 64, %s1377_s15, %s1384_s26  }
  0x37   : > { %s1415_s28 = sadd.s32 4294967295, %s1267_s23   ;;  %s909_s14 = sadd.s32 4294967294, %s1267_s23  }
  0x38   : > { %p64_p1 = scmp.ne.s32.totalorder %s1251_s19, %s1247_s18  ;;  %p1733_p3 = scmp.eq.s32.totalorder %s1415_s28, 0 }
  0x39   : > { %p200_p11 = scmp.eq.s32.totalorder %s1415_s28, 1  ;;  %p206_p0 = scmp.eq.s32.totalorder %s909_s14, 1 }
  0x3a   : > { %p1424_p2 = por %p1733_p3, %p64_p1  ;;  %p910_p4 = scmp.ge.s32.totalorder %s1267_s23, 1 }
  0x3b   : > { %p1756_p5 = scmp.ne.s32.totalorder %s1255_s20, %s1251_s19  ;;  %p1436_p8 = por %p206_p0, %p64_p1 }
  0x3c   : > { %s1755_s16 = scalar_select %p1424_p2, 1, 0 }
  0x3d   : > { %p1432_p6 = por %p200_p11, %p1756_p5  ;;  %p213_p10 = scmp.lt.s32.totalorder %s1267_s23, 3 }
  0x3e   : > { %s1758_s15 = scalar_select %p1436_p8, 1, 0 }
  0x3f   : > { %s1757_s13 = scalar_select %p1432_p6, 1, 0 }
  0x40   : > { %1759 = sst [smem:[#allocation23_spill]] %s1758_s15  ;;  %p1441_p12 = pnand %p910_p4, %p213_p10 }
  0x41   : > { %s1270_s8 = smov [#allocation10]   ;;  %s914_s11 = sshll.u32 %s1263_s22, 7 }
  0x42   : > { %s1760_s10 = scalar_select %p1441_p12, 1, 0 }
  0x43   : > { %s231_s17 = sshll.u32 %s1270_s8, 4  ;;  %p979_p13 = pneg %p1441_p12  ;;  %s1445_s17 = int_to_ptr.vmem [resolvable:$true] %s231_s17 }
  0x44   : > { %s1761_s0 = sld [smem:[#allocation24_spill]]  ;;  %s1763_s8 = sshll.u32 %s1355_s27, 2 }
  0x45   : > { %p1457_p1 = pnand %p979_p13, %p1733_p3  ;;  %s1463_s24 = scalar_lea.vmem [#allocation9], %s1763_s8 }
  0x46   : > { %s298_s30 = sshll.u32 %s1463_s24, 4  ;;  %s246_s22 = scalar_lea.sflag [#allocation5], %s1355_s27  ;;  %s1492_s30 = int_to_ptr.vmem [resolvable:$true] %s298_s30 }
  0x47   : > { %s1762_s1 = scalar_select %p1457_p1, 1, 0 }
  0x4a   : > { %s1453_s9 = scalar_lea.hbm %s1761_s0, %s914_s11  ;;  %s1094_s14 = scalar_lea.hbm %s1761_s0, 1024 }
  0x4b   : > { %s1089_s20 = scalar_lea.hbm %s1453_s9, 512  ;;  %p1095_p5 = scmp.lt.u32.totalorder %s1453_s9, %s1761_s0 }
  0x4c   : > { %p1090_p11 = scmp.ne.s32.totalorder %s1453_s9, %s1089_s20  ;;  %p1096_p10 = scmp.lt.u32.totalorder %s1094_s14, %s1089_s20 }
  0x4d   : > { %p1098_p3 = scmp.lt.u32.totalorder %s1089_s20, %s1453_s9 }
  0x4e   : > { %p1092_p0 = pnand %p1090_p11, %p1390_p9  ;;  %p1097_p13 = por %p1096_p10, %p1095_p5 }
  0x50   : > { %p1093_p4 = pneg %p1092_p0  ;;  %p1099_p8 = por %p1098_p3, %p1097_p13 }
  0x52   : > { %p1100_p6 = pnand %p1099_p8, %p1093_p4 }
  0x54   : > { %1103 = shalt.err (!%p1100_p6)
}
  0x55   : > { %s1104_s8 = scalar_lea.vmem %s1366_s7, 512  ;;  %s1271_s11 = smov [#allocation4]  }
  0x56   : > { %p1105_p11 = scmp.ne.s32.totalorder %s1366_s7, %s1104_s8  ;;  %s1109_s12 = sshll.u32 %s1271_s11, 4  ;;  %s1110_s12 = int_to_ptr.vmem [resolvable:$false] %s1109_s12 }
  0x57   : > { %s1111_s23 = scalar_lea.vmem %s1110_s12, 1024  ;;  %p1112_p12 = scmp.lt.s32.totalorder %s1366_s7, %s1110_s12 }
  0x58   : > { %p1107_p0 = pnand %p1105_p11, %p1390_p9  ;;  %p1113_p1 = scmp.lt.s32.totalorder %s1111_s23, %s1104_s8 }
  0x5a   : > { %p1108_p2 = pneg %p1107_p0  ;;  %p1114_p5 = por %p1113_p1, %p1112_p12 }
  0x5c   : > { %p1115_p10 = pnand %p1114_p5, %p1108_p2 }
  0x5e   : > { %1118 = shalt.err (!%p1115_p10)
}
  0x5f   : > { %s1272_s20 = smov 256   ;;  %s1273_s15 = smov 128  }
  0x60   : > { %s1274_s14 = smov 8   ;;  %s1119_s12 = scalar_lea.hbm %s1722_s3, 256 }
  0x61   : > { %986 = dma.hbm_to_vmem [thread:$0]  (!%p1358_p7), %s1453_s9, 512, %s1366_s7, %s246_s22, %s1272_s20, %s1273_s15, %s1274_s14  }
  0x62   : > { %p1120_p3 = scmp.ne.s32.totalorder %s1722_s3, %s1119_s12  ;;  %p1764_p2 = scmp.ne.s32.totalorder %s1762_s1, 0 }
  0x63   : > { %p1126_p1 = scmp.lt.u32.totalorder %s1119_s12, %s1722_s3 }
  0x64   : > { %p1121_p6 = pneg %p1764_p2 }
  0x66   : > { %p1122_p8 = pnand %p1121_p6, %p1120_p3 }
  0x68   : > { %p1123_p12 = pneg %p1122_p8 }
  0x6a   : > { %p1128_p4 = pnand %p1126_p1, %p1123_p12 }
  0x6c   : > { %1131 = shalt.err (!%p1128_p4)
}
  0x6d   : > { %s1132_s22 = scalar_lea.vmem %s1445_s17, 256  ;;  %p1140_p5 = scmp.lt.s32.totalorder %s1445_s17, %s1445_s17 }
  0x6e   : > { %p1133_p13 = scmp.ne.s32.totalorder %s1445_s17, %s1132_s22  ;;  %p1141_p10 = scmp.lt.s32.totalorder %s1132_s22, %s1132_s22 }
  0x70   : > { %p1135_p11 = pnand %p1133_p13, %p1121_p6  ;;  %p1142_p7 = por %p1141_p10, %p1140_p5 }
  0x72   : > { %p1136_p0 = pneg %p1135_p11 }
  0x74   : > { %p1143_p9 = pnand %p1142_p7, %p1136_p0 }
  0x76   : > { %1146 = shalt.err (!%p1143_p9)
}
  0x77   : > { %982 = dma.hbm_to_vmem [thread:$0]  (!%p1764_p2), %s1722_s3, 256, %s1445_s17, [#allocation11], %s1273_s15, %s1273_s15, %s1274_s14  }
  0x78   : > { %s1147_s18 = scalar_lea.hbm %s1382_s25, 64  ;;  %p1765_p6 = scmp.ne.s32.totalorder %s1754_s6, 0 }
  0x79   : > { %p1148_p3 = scmp.ne.s32.totalorder %s1382_s25, %s1147_s18  ;;  %s1152_s7 = scalar_lea.hbm %s1721_s2, 128 }
  0x7a   : > { %p1153_p7 = scmp.lt.u32.totalorder %s1382_s25, %s1721_s2  ;;  %p1154_p9 = scmp.lt.u32.totalorder %s1152_s7, %s1147_s18 }
  0x7b   : > { %p1150_p8 = pnand %p1148_p3, %p1765_p6  ;;  %p1156_p4 = scmp.lt.u32.totalorder %s1147_s18, %s1382_s25 }
  0x7c   : > { %p1155_p1 = por %p1154_p9, %p1153_p7 }
  0x7d   : > { %p1151_p12 = pneg %p1150_p8 }
  0x7e   : > { %p1157_p13 = por %p1156_p4, %p1155_p1 }
  0x80   : > { %p1158_p11 = pnand %p1157_p13, %p1151_p12 }
  0x82   : > { %1161 = shalt.err (!%p1158_p11)
}
  0x83   : > { %s1162_s17 = scalar_lea.vmem %s1492_s30, 64  ;;  %s1275_s20 = smov [#allocation9]  }
  0x84   : > { %p1163_p2 = scmp.ne.s32.totalorder %s1492_s30, %s1162_s17  ;;  %s1167_s15 = sshll.u32 %s1275_s20, 4  ;;  %s1168_s15 = int_to_ptr.vmem [resolvable:$false] %s1167_s15 }
  0x85   : > { %s1169_s14 = scalar_lea.vmem %s1168_s15, 128  ;;  %p1170_p10 = scmp.lt.s32.totalorder %s1492_s30, %s1168_s15 }
  0x86   : > { %p1165_p0 = pnand %p1163_p2, %p1765_p6  ;;  %p1171_p3 = scmp.lt.s32.totalorder %s1169_s14, %s1162_s17 }
  0x88   : > { %p1166_p5 = pneg %p1165_p0  ;;  %p1172_p8 = por %p1171_p3, %p1170_p10 }
  0x8a   : > { %p1173_p7 = pnand %p1172_p8, %p1166_p5 }
  0x8c   : > { %1176 = shalt.err (!%p1173_p7)
}
  0x8d   : > { %p1766_p12 = scmp.ne.s32.totalorder %s1751_s29, 0  ;;  %p1767_p9 = scmp.ne.s32.totalorder %s1760_s10, 0 }
  0x8e   : > { %s1540_s6 = sand.u32 (!%p1767_p9), 1, %s1251_s19   ;;  %p1768_p6 = scmp.ne.s32.totalorder (!%p1767_p9), %s1755_s16, 0 }
  0x8f   : > { %992 = dma.hbm_to_vmem [thread:$0]  (!%p1766_p12), %s1382_s25, 64, %s1492_s30, %s1384_s26  }
  0x90   : > { %313 = sbr.rel (%p1767_p9) target bundleno = 448 (0x1c0), region = 40  ;;  %s920_s11 = sshll.u32 (!%p1767_p9), %s1540_s6, 5 }
  0x91   : > { %s316_s8 = scalar_lea.sflag (!%p1767_p9), [#allocation5], %s1540_s6  ;;  %s1544_s12 = scalar_lea.vmem (!%p1767_p9), [#allocation4], %s920_s11 }
  0x97   : > { %1230 = dma.done.wait (%p1768_p6), %s316_s8, 512  }
  0x98   : > { %1232 = vsyncadd (%p1768_p6), %s316_s8, 4294966784  ;;  %s324_s29 = sand.u32 1, %s1415_s28   ;;  %s921_s30 = sshll.u32 %s1540_s6, 2 }
  0x99   : > { %s325_s25 = scalar_lea.sflag [#allocation8], %s324_s29  ;;  %s328_s26 = scalar_lea.vmem [#allocation7], %s921_s30 }
  0x9a   : > { %1234 = dma.done.wait (%p1768_p6), %s325_s25, 128  }
  0x9b   : > { %1236 = vsyncadd (%p1768_p6), %s325_s25, 4294967168  ;;  %s337_s10 = scalar_lea.vmem [#allocation9], %s921_s30  ;;  %p1769_p1 = scmp.eq.s32.totalorder %s1415_s28, 0 }
  0x9d   : > { %1238 = dma.done.wait (%p1769_p1), [#allocation11], 256   ;;  %p1770_p4 = pmov %p1769_p1 }
  0x9e   : > { %v411_v0 = vlaneseq  ;;  %v1563_v4 = vld [vmem:[%s1544_s12] sm:$0xff]  ;;  %v1566_v5 = vld [vmem:[%s1544_s12 + $0x8] sm:$0xff]  ;;  %v1584_v22 = vld [vmem:[%s1544_s12 + $0x10] sm:$0xff]  ;;  %p383_p13 = scmp.lt.s32.totalorder %s1259_s21, 1  ;;  %s924_s16 = sshll.u32 %s1540_s6, 3 }
  0x9f   : > { %1240 = vsyncadd (%p1770_p4), [#allocation11], 4294967040  ;;  %v396_v6 = vld [vmem:[%s328_s26] sm:$0xf]  ;;  %v397_v9 = vld [vmem:[%s337_s10] sm:$0xf] }
  0xa0   : > { %v412_v1 = vshrl.u32 %v411_v0, 7  ;;  %v1572_v10 = vpack.i.b16 %v396_v6, %v396_v6  ;;  %v451_v11 = vshrl.u32 %v396_v6, 16  ;;  %v518_v12 = vshra.s32 %v1563_v4, 16  ;;  %v1587_v23 = vld [vmem:[%s1544_s12 + $0x18] sm:$0xff]  ;;  %s384_s28 = scalar_select %p383_p13, %s1259_s21, 1 }
  0xa1   : > { %v519_v13 = vshra.s32 %v1566_v5, 16  ;;  %v1576_v14 = vpack.i.b16 %v397_v9, %v397_v9  ;;  %v442_v15 = vshrl.u32 %v397_v9, 16  ;;  %v398_v16 = vand.u32 15, %v1563_v4  ;;  %v1058_v24 = vld [vmem:[#allocation10 + $0x4] ss:$8 sps:$4 sm:$0xff]   ;;  %s380_s5 = scalar_lea.vmem [#allocation12], %s924_s16 }
  0xa2   : > { %v534_v2 = vsub.s32 2, %v412_v1  ;;  %v1560_v3 = vsub.s32 0, %v412_v1  ;;  %v1568_v7 = vsub.s32 3, %v412_v1  ;;  %v1570_v8 = vsub.s32 1, %v412_v1  ;;  %698 = vmatprep.mubr.bf16.mxu0 %v1058_v24  ;;  %s385_s0 = scalar_lea.vmem %s1723_s4, %s384_s28  ;;  %s751_s18 = sshll.u32 %s380_s5, 4  ;;  %s1665_s18 = int_to_ptr.vmem [resolvable:$true] %s751_s18 }
  0xa3   : > { %v399_v17 = vand.u32 15, %v1566_v5  ;;  %v1580_v18 = vpack.i.b16 %v451_v11, %v451_v11  ;;  %v522_v19 = vand.u32 15, %v518_v12  ;;  %v523_v20 = vand.u32 15, %v519_v13  ;;  %s935_s24 = sshll.u32 %s1259_s21, 6  ;;  %s1771_s1 = sld [smem:[#allocation26_spill]] }
  0xa4   : > { %v541_v21 = vrot.slane %v1572_v10, %v534_v2  ;;  %v1589_v25 = vpack.i.b16 %v442_v15, %v442_v15  ;;  %v535_v26 = vrot.slane %v1576_v14, %v534_v2  ;;  %v402_v27 = vcvt.s32.f32 %v398_v16  ;;  %s736_s17 = scalar_lea.sflag [#allocation6], %s1540_s6  ;;  %s1177_s20 = scalar_lea.vmem %s1665_s18, 128 }
  0xa5   : > { %v403_v28 = vcvt.s32.f32 %v399_v17  ;;  %v526_v29 = vcvt.s32.f32 %v522_v19  ;;  %v527_v30 = vcvt.s32.f32 %v523_v20  ;;  %v414_v31 = vrot.slane %v1576_v14, %v1560_v3  ;;  %p1178_p11 = scmp.ne.s32.totalorder %s1665_s18, %s1177_s20  ;;  %p1772_p2 = scmp.ne.s32.totalorder %s1757_s13, 0 }
  0xa6   : > { %v423_v32 = vrot.slane %v1572_v10, %v1560_v3  ;;  %v520_v34 = vshra.s32 %v1584_v22, 16  ;;  %v521_v35 = vshra.s32 %v1587_v23, 16  ;;  %v400_v36 = vand.u32 15, %v1584_v22  ;;  %s1276_s21 = smov [#allocation12]  }
  0xa7   : > { %v406_v33 = vpack.c.bf16 %v403_v28, %v402_v27  ;;  %v530_v37 = vpack.c.bf16 %v527_v30, %v526_v29  ;;  %v401_v38 = vand.u32 15, %v1587_v23  ;;  %v546_v39 = vshra.s32 %v1563_v4, 20  ;;  %p1179_p0 = pnand %p1178_p11, %p1772_p2  ;;  %s1181_s15 = sshll.u32 %s1276_s21, 4  ;;  %s1182_s15 = int_to_ptr.vmem [resolvable:$false] %s1181_s15 }
  0xa8   : > { %v547_v40 = vshra.s32 %v1566_v5, 20  ;;  %v524_v42 = vand.u32 15, %v520_v34  ;;  %v525_v43 = vand.u32 15, %v521_v35  ;;  %v404_v44 = vcvt.s32.f32 %v400_v36  ;;  %s1183_s14 = scalar_lea.vmem %s1182_s15, 256  ;;  %p1184_p10 = scmp.lt.s32.totalorder %s1665_s18, %s1182_s15 }
  0xa9   : > { %v415_v41 = vsub.bf16 %v406_v33, %v414_v31  ;;  %v536_v45 = vsub.bf16 %v530_v37, %v535_v26  ;;  %v405_v46 = vcvt.s32.f32 %v401_v38  ;;  %v550_v47 = vand.u32 15, %v546_v39  ;;  %s1670_s9 = scalar_lea.hbm %s1771_s1, %s935_s24  ;;  %p1180_p5 = pneg %p1179_p0 }
  0xaa   : > { %v551_v48 = vand.u32 15, %v547_v40  ;;  %v528_v50 = vcvt.s32.f32 %v524_v42  ;;  %v529_v51 = vcvt.s32.f32 %v525_v43  ;;  %v1603_v52 = vrot.slane %v1589_v25, %v534_v2  ;;  %p1185_p3 = scmp.lt.s32.totalorder %s1183_s14, %s1177_s20 }
  0xab   : > { %v424_v49 = vmul.bf16 %v423_v32, %v415_v41  ;;  %v542_v53 = vmul.bf16 %v541_v21, %v536_v45  ;;  %v407_v54 = vpack.c.bf16 %v405_v46, %v404_v44  ;;  %v554_v55 = vcvt.s32.f32 %v550_v47 }
  0xac   : > { %v555_v56 = vcvt.s32.f32 %v551_v48  ;;  %v531_v57 = vpack.c.bf16 %v529_v51, %v528_v50  ;;  %v569_v58 = vrot.slane %v1580_v18, %v534_v2  ;;  %v428_v59 = vshra.s32 %v1563_v4, 4  ;;  %p1186_p8 = por %p1185_p3, %p1184_p10 }
  0xad   : > { %v429_v60 = vshra.s32 %v1566_v5, 4  ;;  %945 = vmatprep.subr.bf16.mxu0 %v542_v53  ;;  %v416_v61 = vsub.bf16 %v407_v54, %v414_v31  ;;  %v448_v63 = vrot.slane %v1589_v25, %v1560_v3  ;;  %v457_v0 = vrot.slane %v1580_v18, %v1560_v3 }
  0xae   : > { %v558_v62 = vpack.c.bf16 %v555_v56, %v554_v55  ;;  %946 = vmatpush3.bf16.msra.mxu0 %v424_v49  ;;  %v537_v1 = vsub.bf16 %v531_v57, %v535_v26  ;;  %v432_v6 = vand.u32 15, %v428_v59  ;;  %v548_v11 = vshra.s32 %v1584_v22, 20  ;;  %p1187_p7 = pnand %p1186_p8, %p1180_p5 }
  0xaf   : > { %v433_v9 = vand.u32 15, %v429_v60  ;;  %v425_v2 = vmul.bf16 %v423_v32, %v416_v61  ;;  %v549_v13 = vshra.s32 %v1587_v23, 20  ;;  %v430_v15 = vshra.s32 %v1584_v22, 4 }
  0xb0   : > { %v564_v12 = vsub.bf16 %v558_v62, %v1603_v52  ;;  %v543_v16 = vmul.bf16 %v541_v21, %v537_v1  ;;  %v436_v17 = vcvt.s32.f32 %v432_v6  ;;  %v552_v20 = vand.u32 15, %v548_v11 }
  0xb1   : > { %v437_v19 = vcvt.s32.f32 %v433_v9  ;;  %v553_v27 = vand.u32 15, %v549_v13  ;;  %v431_v3 = vshra.s32 %v1587_v23, 4  ;;  %v434_v26 = vand.u32 15, %v430_v15 }
  0xb2   : > { %v570_v24 = vmul.bf16 %v569_v58, %v564_v12  ;;  %947 = vmatprep.subr.bf16.mxu0 %v543_v16  ;;  %v556_v29 = vcvt.s32.f32 %v552_v20  ;;  %v574_v30 = vshra.s32 %v1563_v4, 24  ;;  %v575_v31 = vshra.s32 %v1566_v5, 24 }
  0xb3   : > { %v440_v28 = vpack.c.bf16 %v437_v19, %v436_v17  ;;  %948 = vmatpush3.bf16.msra.mxu0 %v425_v2  ;;  %v557_v32 = vcvt.s32.f32 %v553_v27  ;;  %v435_v33 = vand.u32 15, %v431_v3  ;;  %v438_v34 = vcvt.s32.f32 %v434_v26 }
  0xb4   : > { %v1621_v21 = vrot.slane %v1576_v14, %v1568_v7  ;;  %949 = vmatprep.subr.bf16.mxu0 %v570_v24  ;;  %v578_v36 = vand.u32 15, %v574_v30  ;;  %v579_v37 = vand.u32 15, %v575_v31  ;;  %v597_v38 = vrot.slane %v1572_v10, %v1568_v7 }
  0xb5   : > { %v449_v35 = vsub.bf16 %v440_v28, %v448_v63  ;;  %v559_v39 = vpack.c.bf16 %v557_v32, %v556_v29  ;;  %v439_v40 = vcvt.s32.f32 %v435_v33  ;;  %v462_v41 = vshra.s32 %v1563_v4, 8 }
  0xb6   : > { %v463_v42 = vshra.s32 %v1566_v5, 8  ;;  %v582_v44 = vcvt.s32.f32 %v578_v36  ;;  %v583_v45 = vcvt.s32.f32 %v579_v37  ;;  %v1629_v46 = vrot.slane %v1576_v14, %v1570_v8 }
  0xb7   : > { %v458_v43 = vmul.bf16 %v457_v0, %v449_v35  ;;  %v565_v47 = vsub.bf16 %v559_v39, %v1603_v52  ;;  %v441_v48 = vpack.c.bf16 %v439_v40, %v438_v34  ;;  %v466_v49 = vand.u32 15, %v462_v41 }
  0xb8   : > { %v467_v50 = vand.u32 15, %v463_v42  ;;  %v586_v51 = vpack.c.bf16 %v583_v45, %v582_v44  ;;  %v485_v53 = vrot.slane %v1572_v10, %v1570_v8  ;;  %v576_v54 = vshra.s32 %v1584_v22, 24 }
  0xb9   : > { %950 = vmatpush3.bf16.msra.mxu0 %v458_v43  ;;  %v577_v55 = vshra.s32 %v1587_v23, 24  ;;  %v571_v56 = vmul.bf16 %v569_v58, %v565_v47  ;;  %v450_v57 = vsub.bf16 %v441_v48, %v448_v63  ;;  %v470_v59 = vcvt.s32.f32 %v466_v49 }
  0xba   : > { %v471_v60 = vcvt.s32.f32 %v467_v50  ;;  %v592_v14 = vsub.bf16 %v586_v51, %v1621_v21  ;;  %v580_v61 = vand.u32 15, %v576_v54  ;;  %v464_v62 = vshra.s32 %v1584_v22, 8 }
  0xbb   : > { %v581_v52 = vand.u32 15, %v577_v55  ;;  %951 = vmatprep.subr.bf16.mxu0 %v571_v56  ;;  %v459_v1 = vmul.bf16 %v457_v0, %v450_v57  ;;  %v465_v9 = vshra.s32 %v1587_v23, 8  ;;  %v925_v10 = vshrl.u32 %v1563_v4, 28 }
  0xbc   : > { %v474_v6 = vpack.c.bf16 %v471_v60, %v470_v59  ;;  %v598_v11 = vmul.bf16 %v597_v38, %v592_v14  ;;  %v584_v2 = vcvt.s32.f32 %v580_v61  ;;  %v468_v58 = vand.u32 15, %v464_v62  ;;  %v931_v60 = vld [vmem:[%s385_s0] ss:$0 sm:$0xff] }
  0xbd   : > { %v585_v12 = vcvt.s32.f32 %v581_v52  ;;  %952 = vmatpush3.bf16.msra.mxu0 %v459_v1  ;;  %v469_v13 = vand.u32 15, %v465_v9  ;;  %v926_v15 = vshrl.u32 %v1566_v5, 28  ;;  %v610_v16 = vcvt.s32.f32 %v925_v10 }
  0xbe   : > { %v480_v63 = vsub.bf16 %v474_v6, %v1629_v46  ;;  %953 = vmatprep.subr.bf16.mxu0 %v598_v11  ;;  %v472_v19 = vcvt.s32.f32 %v468_v58  ;;  %v619_v0 = vrot.slane %v1589_v25, %v1568_v7  ;;  %v490_v3 = vshra.s32 %v1563_v4, 12 }
  0xbf   : > { %v587_v17 = vpack.c.bf16 %v585_v12, %v584_v2  ;;  %v473_v24 = vcvt.s32.f32 %v469_v13  ;;  %v611_v27 = vcvt.s32.f32 %v926_v15  ;;  %v625_v28 = vrot.slane %v1580_v18, %v1568_v7 }
  0xc0   : > { %v486_v20 = vmul.bf16 %v485_v53, %v480_v63  ;;  %v491_v29 = vshra.s32 %v1566_v5, 12  ;;  %v507_v30 = vrot.slane %v1589_v25, %v1570_v8  ;;  %v494_v33 = vand.u32 15, %v490_v3 }
  0xc1   : > { %v593_v26 = vsub.bf16 %v587_v17, %v1621_v21  ;;  %v475_v31 = vpack.c.bf16 %v473_v24, %v472_v19  ;;  %v614_v32 = vpack.c.bf16 %v611_v27, %v610_v16  ;;  %v927_v34 = vshrl.u32 %v1584_v22, 28 }
  0xc2   : > { %954 = vmatpush3.bf16.msra.mxu0 %v486_v20  ;;  %v495_v36 = vand.u32 15, %v491_v29  ;;  %v928_v4 = vshrl.u32 %v1587_v23, 28  ;;  %v492_v21 = vshra.s32 %v1584_v22, 12  ;;  %v498_v39 = vcvt.s32.f32 %v494_v33 }
  0xc3   : > { %v599_v35 = vmul.bf16 %v597_v38, %v593_v26  ;;  %v481_v37 = vsub.bf16 %v475_v31, %v1629_v46  ;;  %v620_v7 = vsub.bf16 %v614_v32, %v619_v0  ;;  %v612_v5 = vcvt.s32.f32 %v927_v34 }
  0xc4   : > { %v499_v40 = vcvt.s32.f32 %v495_v36  ;;  %v613_v25 = vcvt.s32.f32 %v928_v4  ;;  %v493_v41 = vshra.s32 %v1587_v23, 12  ;;  %v496_v42 = vand.u32 15, %v492_v21 }
  0xc5   : > { %955 = vmatprep.subr.bf16.mxu0 %v599_v35  ;;  %v487_v43 = vmul.bf16 %v485_v53, %v481_v37  ;;  %v626_v44 = vmul.bf16 %v625_v28, %v620_v7  ;;  %v513_v38 = vrot.slane %v1580_v18, %v1570_v8  ;;  %v1056_v8 = vld [vmem:[#allocation10] ss:$8 sps:$4 sm:$0xff]  }
  0xc6   : > { %v502_v45 = vpack.c.bf16 %v499_v40, %v498_v39  ;;  %v615_v47 = vpack.c.bf16 %v613_v25, %v612_v5  ;;  %v497_v48 = vand.u32 15, %v493_v41  ;;  %v500_v22 = vcvt.s32.f32 %v496_v42 }
  0xc7   : > { %956 = vmatpush3.bf16.msra.mxu0 %v487_v43 }
  0xc8   : > { %957 = vmatprep.subr.bf16.mxu0 %v626_v44  ;;  %v508_v46 = vsub.bf16 %v502_v45, %v507_v30  ;;  %v621_v49 = vsub.bf16 %v615_v47, %v619_v0  ;;  %v501_v50 = vcvt.s32.f32 %v497_v48 }
  0xca   : > { %v514_v51 = vmul.bf16 %v513_v38, %v508_v46  ;;  %v627_v23 = vmul.bf16 %v625_v28, %v621_v49  ;;  %v503_v54 = vpack.c.bf16 %v501_v50, %v500_v22 }
  0xcc   : > { %958 = vmatpush3.bf16.msra.mxu0 %v514_v51  ;;  %v509_v53 = vsub.bf16 %v503_v54, %v507_v30 }
  0xcd   : > { %959 = vmatprep.subr.bf16.mxu0 %v627_v23 }
  0xce   : > { %v515_v55 = vmul.bf16 %v513_v38, %v509_v53 }
  0xd0   : > { %960 = vmatpush3.bf16.msra.mxu0 %v515_v55 }
  0xd3   : > { %699 = vmatmul.mubr.bf16.vlgmr.msra.gmra.mrb[0].mxu0 %v1056_v8 }
 0x1a6   : > { %v961_v18 = vpop.f32.mrb[0].mxu0 }
 0x1a7   : > { %v962_v56 = vpop.f32.mrb[1].mxu0 }
 0x1a8   : > { %v963_v57 = vadd.f32 %v962_v56, %v961_v18  ;;  %v964_v59 = vpop.f32.mrb[2].mxu0 }
 0x1a9   : > { %v965_v14 = vpop.f32.mrb[3].mxu0 }
 0x1aa   : > { %v966_v61 = vadd.f32 %v965_v14, %v964_v59  ;;  %v723_v52 = vadd.f32 %v963_v57, %v931_v60 }
 0x1ac   : > { %v724_v62 = vadd.f32 %v966_v61, %v931_v60 }
 0x1ae   : > { %v943_v1 = vpack.c.bf16 %v724_v62, %v723_v52 }
 0x1b0   : > { %944 = vst [vmem:[%s380_s5] sm:$0xff] %v943_v1  }
 0x1b1   : > { %1190 = shalt.err (!%p1187_p7)
}
 0x1b2   : > { %s1191_s11 = scalar_lea.hbm %s1670_s9, 128  ;;  %s1195_s29 = scalar_lea.hbm %s1771_s1, 256 }
 0x1b3   : > { %p1192_p12 = scmp.ne.s32.totalorder %s1670_s9, %s1191_s11  ;;  %p1196_p1 = scmp.lt.u32.totalorder %s1670_s9, %s1771_s1 }
 0x1b4   : > { %p1197_p4 = scmp.lt.u32.totalorder %s1195_s29, %s1191_s11  ;;  %p1199_p11 = scmp.lt.u32.totalorder %s1191_s11, %s1670_s9 }
 0x1b5   : > { %p1193_p9 = pnand %p1192_p12, %p1772_p2 }
 0x1b6   : > { %p1198_p13 = por %p1197_p4, %p1196_p1 }
 0x1b7   : > { %p1194_p6 = pneg %p1193_p9 }
 0x1b8   : > { %p1200_p0 = por %p1199_p11, %p1198_p13 }
 0x1ba   : > { %p1201_p5 = pnand %p1200_p0, %p1194_p6 }
 0x1bc   : > { %1204 = shalt.err (!%p1201_p5)
}
 0x1bd   : > { %s1277_s26 = smov 64   ;;  %s1278_s10 = smov 128  }
 0x1be   : > { %s1279_s28 = smov 4  }
 0x1bf   : > { %977 = dma.vmem_to_hbm [thread:$0]  (%p1772_p2), %s1665_s18, 128, %s1670_s9, %s736_s17, %s1277_s26, %s1278_s10, %s1279_s28  }
 0x1c0 PF: > { %s1773_s16 = sld [smem:[#allocation17_spill]]  ;;  %s1774_s23 = sld [smem:[#allocation23_spill]] }
 0x1c1   : > { %s1775_s22 = sld [smem:[#allocation20_spill]] }
 0x1c6   : > { %s766_s0 = sand.u32 1, %s1773_s16   ;;  %p1776_p10 = scmp.ne.s32.totalorder %s1774_s23, 0 }
 0x1c7   : > { %p1777_p3 = scmp.ge.s32.totalorder %s1775_s22, 2  ;;  %s767_s5 = scalar_lea.sflag [#allocation6], %s766_s0 }
 0x1c9   : > { %p994_p8 = pnand %p1777_p3, %p1776_p10 }
 0x1cb   : > { %1242 = dma.done.wait (!%p994_p8), %s767_s5, 128  }
 0x1cc   : > { %1244 = vsyncadd (!%p994_p8), %s767_s5, 4294967168  ;;  %s25_s23 = sadd.s32 1, %s1775_s22   ;;  %s1778_s24 = sld [smem:[#allocation18_spill]] }
 0x1cd   : > { %p22_p7 = scmp.ge.s32.totalorder %s25_s23, 4   ;;  %s1779_s20 = sld [smem:[#allocation22_spill]] }
 0x1ce   : > { %s1780_s21 = sld [smem:[#allocation19_spill]]  ;;  %s1781_s22 = sld [smem:[#allocation21_spill]] }
 0x1cf   : > { %s1782_s18 = smov %s1251_s19  ;;  %24 = sbr.rel (!%p22_p7) target bundleno = 13 (0xd), region = 129 }
 0x1d2   : > { %s1783_s19 = smov %s1778_s24 }
 0x1d6   :  { %772 = vsyncpa [#allocation5], 1 }
 0x1d7   :  { %774 = vsyncpa [#allocation5 + $0x1], 1 }
 0x1d8   :  { %775 = vsyncpa [#allocation8], 1 }
 0x1d9   :  { %777 = vsyncpa [#allocation8 + $0x1], 1 }
 0x1da   :  { %778 = vsyncpa [#allocation11], 1 }
 0x1db   :  { %779 = vsyncpa [#allocation6], 1 }
 0x1dc   :  { %781 = vsyncpa [#allocation6 + $0x1], 1 }

</bundles_post_ra>
